<compile_context>
chip_gen: v5e
topology: v5e:2x2
jax: 0.10.0
libtpu: 0.0.40
codegen_flags: <defaults>
</compile_context>

<pallas_src>
import functools
import math

import jax
import jax.numpy as jnp
from jax.experimental import pallas as pl
from jax.experimental.pallas import tpu as pltpu


def _loss_kernel(x_ref, y_ref, out_ref, *, name, k, d):
    """One grid step: (tm, k*d) tile of x/y -> (tm, k) per-logical-row sums."""
    x = x_ref[...].astype(jnp.float32)
    y = y_ref[...].astype(jnp.float32)

    if name == "mse":
        elem = (x - y) * (x - y)
    elif name == "mae":
        elem = jnp.abs(x - y)
    elif name == "bce":
        # PyTorch's binary_cross_entropy clamps the log terms at -100.
        log_x = jnp.maximum(jnp.log(x), -100.0)
        log_1mx = jnp.maximum(jnp.log(1.0 - x), -100.0)
        elem = -(y * log_x + (1.0 - y) * log_1mx)
    else:
        raise ValueError(f"Unknown loss type '{name}'.")

    if k == 1:
        out_ref[...] = jnp.sum(elem, axis=-1, keepdims=True)
    else:
        # k logical rows are packed side-by-side along lanes; reduce each
        # d-wide segment separately (k is small, e.g. 4 for d=32).
        parts = [
            jnp.sum(elem[:, j * d:(j + 1) * d], axis=-1, keepdims=True)
            for j in range(k)
        ]
        out_ref[...] = jnp.concatenate(parts, axis=-1)


def _round_up(a, b):
    return ((a + b - 1) // b) * b


def loss_wrapper(x, y, *, name="mse", reduction="mean", multi_step=False,
                 reduce=True):
    """JAX/Pallas equivalent of LossWrapper.forward(x, y, reduce)."""
    if name not in ("mse", "mae", "bce"):
        raise ValueError(f"Unknown loss type '{name}'.")
    if reduce and reduction not in ("mean", "sum"):
        raise ValueError(f"Unknown reduction with '{reduction}'.")

    orig_shape = x.shape
    D = orig_shape[-1]
    M = math.prod(orig_shape[:-1]) if len(orig_shape) > 1 else 1

    # Native dtype straight into the kernel (bf16 stays bf16 in HBM).
    x2 = jnp.reshape(x, (M, D))
    y2 = jnp.reshape(y, (M, D))

    # Lane packing for small feature dims: fold k logical rows into one
    # 128-lane physical row (D=32 -> k=4, W=128).
    if D < 128 and 128 % D == 0:
        k = min(128 // D, 32)
    else:
        k = 1
    W = k * D

    # Zero-pad logical rows so they fold evenly; zero rows contribute 0 to
    # mse / mae / (clamped) bce, so totals are unaffected.
    Mk = _round_up(M, k)
    if Mk != M:
        x2 = jnp.pad(x2, ((0, Mk - M), (0, 0)))
        y2 = jnp.pad(y2, ((0, Mk - M), (0, 0)))
    rows = Mk // k
    x2 = jnp.reshape(x2, (rows, W))
    y2 = jnp.reshape(y2, (rows, W))

    # Row-tile size: ~4 MiB input tiles (HBM-roofline plateau), capped at
    # 1024 rows, multiple of 8 sublanes, never larger than the (padded) array.
    itemsize = jnp.dtype(x2.dtype).itemsize
    row_bytes = W * itemsize
    tm = max(1, (4 * 1024 * 1024) // max(row_bytes, 1))
    tm = min(tm, 1024)
    tm = max(8, (tm // 8) * 8)
    tm = min(tm, _round_up(rows, 8))
    # TODO(synk): for extremely wide D (row > ~4 MiB) add a second grid axis
    # over D with a per-row scratch accumulator instead of shrinking tm.

    rows_pad = _round_up(rows, tm)
    if rows_pad != rows:
        x2 = jnp.pad(x2, ((0, rows_pad - rows), (0, 0)))
        y2 = jnp.pad(y2, ((0, rows_pad - rows), (0, 0)))
    grid = (rows_pad // tm,)

    tile_bytes = tm * W * itemsize
    out_tile_bytes = tm * k * 4
    vmem_limit = int(min(64 * 1024 * 1024,
                         max(32 * 1024 * 1024,
                             2 * 2 * tile_bytes + 2 * out_tile_bytes
                             + 8 * 1024 * 1024)))

    row_sums = pl.pallas_call(
        functools.partial(_loss_kernel, name=name, k=k, d=D),
        out_shape=jax.ShapeDtypeStruct((rows_pad, k), jnp.float32),
        grid_spec=pltpu.PrefetchScalarGridSpec(
            num_scalar_prefetch=0,
            grid=grid,
            in_specs=[
                pl.BlockSpec((tm, W), lambda i: (i, 0)),
                pl.BlockSpec((tm, W), lambda i: (i, 0)),
            ],
            out_specs=pl.BlockSpec((tm, k), lambda i: (i, 0)),
        ),
        compiler_params=pltpu.CompilerParams(
            # No resident accumulator -> grid axis can shard across TCs (v7x).
            dimension_semantics=("parallel",),
            vmem_limit_bytes=vmem_limit,
        ),
    )(x2, y2)

    # Row-major flatten of (rows_pad, k) recovers logical row order; padded
    # rows land at the tail and are dropped.
    per_row = jnp.reshape(row_sums, (rows_pad * k,))[:M]  # == loss.sum(dim=-1)

    if not reduce:
        loss = jnp.reshape(per_row, orig_shape[:-1])
        if multi_step:
            loss = jnp.sum(loss, axis=-1)
        return loss

    total = jnp.sum(per_row)  # cheap XLA tree-reduce over M scalars
    if reduction == "sum":
        return total
    # mean is taken AFTER the optional multi_step sum, matching torch.
    count = math.prod(orig_shape[:-2]) if multi_step else math.prod(orig_shape[:-1])
    count = max(int(count), 1)
    return total / jnp.float32(count)


if __name__ == "__main__":
    key = jax.random.PRNGKey(0)
    kx, ky = jax.random.split(key)

    # Small shapes consistent with the module: (batch=2, seq=8, hidden=32).
    B, S, H = 2, 8, 32
    x = jax.random.normal(kx, (B, S, H), dtype=jnp.float32)
    y = jax.random.normal(ky, (B, S, H), dtype=jnp.float32)

    # mse / mean / single-step (reduce=True) — default LossWrapper config.
    out = loss_wrapper(x, y, name="mse", reduction="mean",
                       multi_step=False, reduce=True)
    out = jax.block_until_ready(out)
    ref = jnp.mean(jnp.sum((x - y) ** 2, axis=-1))
    assert jnp.allclose(out, ref, rtol=1e-5, atol=1e-5), (out, ref)

    # mae / sum / multi_step.
    out2 = loss_wrapper(x, y, name="mae", reduction="sum",
                        multi_step=True, reduce=True)
    ref2 = jnp.sum(jnp.abs(x - y))
    assert jnp.allclose(out2, ref2, rtol=1e-5, atol=1e-5), (out2, ref2)

    # bce / reduce=False path.
    xs = jax.nn.sigmoid(x)
    ys = jax.nn.sigmoid(y)
    out3 = loss_wrapper(xs, ys, name="bce", reduction="mean",
                        multi_step=False, reduce=False)
    ref3 = jnp.sum(-(ys * jnp.log(xs) + (1.0 - ys) * jnp.log(1.0 - xs)), axis=-1)
    assert out3.shape == (B, S)
    assert jnp.allclose(out3, ref3, rtol=1e-5, atol=1e-5)

    # bf16 inputs stream in native dtype (no f32 HBM copy), upcast in-kernel.
    xb = x.astype(jnp.bfloat16)
    yb = y.astype(jnp.bfloat16)
    out4 = loss_wrapper(xb, yb, name="mse", reduction="mean")
    ref4 = jnp.mean(jnp.sum(
        (xb.astype(jnp.float32) - yb.astype(jnp.float32)) ** 2, axis=-1))
    assert jnp.allclose(out4, ref4, rtol=2e-2, atol=2e-2), (out4, ref4)

    jax.block_until_ready((out, out2, out3, out4))
    print("KERNEL_OK")
</pallas_src>

<mosaic_0001>
module attributes {stable_mosaic.version = 11 : i64} {
  func.func @_loss_kernel(%arg0: i32, %arg1: memref<8x128xf32, #tpu.memory_space<vmem>>, %arg2: memref<8x128xf32, #tpu.memory_space<vmem>>, %arg3: memref<8x4xf32, #tpu.memory_space<vmem>>) attributes {dimension_semantics = [#tpu.dimension_semantics<parallel>], iteration_bounds = array<i64: 1>, scalar_prefetch = 0 : i64, scratch_operands = 0 : i64, tpu.core_type = #tpu.core_type<tc>, window_params = [{transform_indices = @transform_0, window_bounds = array<i64: 8, 128>}, {transform_indices = @transform_1, window_bounds = array<i64: 8, 128>}, {transform_indices = @transform_2, window_bounds = array<i64: 8, 4>}]} {
    %c0 = arith.constant 0 : index
    %c0_0 = arith.constant 0 : index
    %0 = vector.load %arg1[%c0, %c0_0] : memref<8x128xf32, #tpu.memory_space<vmem>>, vector<8x128xf32>
    %c0_1 = arith.constant 0 : index
    %c0_2 = arith.constant 0 : index
    %1 = vector.load %arg2[%c0_1, %c0_2] : memref<8x128xf32, #tpu.memory_space<vmem>>, vector<8x128xf32>
    %2 = arith.subf %0, %1 : vector<8x128xf32>
    %3 = arith.subf %0, %1 : vector<8x128xf32>
    %4 = arith.mulf %2, %3 : vector<8x128xf32>
    %5 = vector.extract_strided_slice %4 {offsets = [0, 0], sizes = [8, 32], strides = [1, 1]} : vector<8x128xf32> to vector<8x32xf32>
    %cst = arith.constant dense<0.000000e+00> : vector<8xf32>
    %6 = vector.multi_reduction <add>, %5, %cst [1] : vector<8x32xf32> to vector<8xf32>
    %7 = vector.shape_cast %6 : vector<8xf32> to vector<8x1xf32>
    %8 = vector.extract_strided_slice %4 {offsets = [0, 32], sizes = [8, 32], strides = [1, 1]} : vector<8x128xf32> to vector<8x32xf32>
    %cst_3 = arith.constant dense<0.000000e+00> : vector<8xf32>
    %9 = vector.multi_reduction <add>, %8, %cst_3 [1] : vector<8x32xf32> to vector<8xf32>
    %10 = vector.shape_cast %9 : vector<8xf32> to vector<8x1xf32>
    %11 = vector.extract_strided_slice %4 {offsets = [0, 64], sizes = [8, 32], strides = [1, 1]} : vector<8x128xf32> to vector<8x32xf32>
    %cst_4 = arith.constant dense<0.000000e+00> : vector<8xf32>
    %12 = vector.multi_reduction <add>, %11, %cst_4 [1] : vector<8x32xf32> to vector<8xf32>
    %13 = vector.shape_cast %12 : vector<8xf32> to vector<8x1xf32>
    %14 = vector.extract_strided_slice %4 {offsets = [0, 96], sizes = [8, 32], strides = [1, 1]} : vector<8x128xf32> to vector<8x32xf32>
    %cst_5 = arith.constant dense<0.000000e+00> : vector<8xf32>
    %15 = vector.multi_reduction <add>, %14, %cst_5 [1] : vector<8x32xf32> to vector<8xf32>
    %16 = vector.shape_cast %15 : vector<8xf32> to vector<8x1xf32>
    %17 = tpu.concatenate %7, %10, %13, %16 in 1 : vector<8x1xf32>, vector<8x1xf32>, vector<8x1xf32>, vector<8x1xf32> -> vector<8x4xf32>
    %c0_6 = arith.constant 0 : index
    %c0_7 = arith.constant 0 : index
    %18 = vector.load %arg3[%c0_6, %c0_7] : memref<8x4xf32, #tpu.memory_space<vmem>>, vector<8x4xf32>
    tpu.vector_store %arg3[%c0_6, %c0_7], %17 {strides = array<i32>} : memref<8x4xf32, #tpu.memory_space<vmem>>, vector<8x4xf32>,
    return
  }
  func.func @transform_0(%arg0: i32) -> (i32, i32) {
    %c0_i32 = arith.constant 0 : i32
    %c0_i32_0 = arith.constant 0 : i32
    return %arg0, %c0_i32 : i32, i32
  }
  func.func @transform_1(%arg0: i32) -> (i32, i32) {
    %c0_i32 = arith.constant 0 : i32
    %c0_i32_0 = arith.constant 0 : i32
    return %arg0, %c0_i32 : i32, i32
  }
  func.func @transform_2(%arg0: i32) -> (i32, i32) {
    %c0_i32 = arith.constant 0 : i32
    %c0_i32_0 = arith.constant 0 : i32
    return %arg0, %c0_i32 : i32, i32
  }
}

</mosaic_0001>

<bundles_post_ra>
// kernel: tpu_custom_call.1
= control target key start
LH: loop header
LB: loop body
LE: loop exit
PB: predicated region body
PF: predicated region fallthrough
CT: control target
= control target key end

     0   :  { %7 = vsyncpa [#allocation3], 0  ;;  %s166_s0 = inlined_call_operand.hbm [shape: f32[8,128], index: 0, kind: input, shape index: {}]   ;;  %s167_s1 = inlined_call_operand.hbm [shape: f32[8,128], index: 1, kind: input, shape index: {}]   ;;  %s168_s2 = inlined_call_operand.vmem [shape: f32[8,4], index: 2, kind: output, shape index: {}]  }
   0x1   :  { %s14_s11 = sshll.u32 %s166_s0, 4  ;;  %s15_s11 = int_to_ptr.hbm [resolvable:$true] %s14_s11 }
   0x2   :  { %8 = vsyncpa [#allocation5], 0  ;;  %s137_s12 = smov [#allocation2]   ;;  %s25_s16 = sshll.u32 %s167_s1, 4  ;;  %s26_s16 = int_to_ptr.hbm [resolvable:$true] %s25_s16 }
   0x3   :  { %s16_s13 = sshll.u32 %s137_s12, 4  ;;  %s138_s17 = smov [#allocation4]   ;;  %s17_s13 = int_to_ptr.vmem [resolvable:$true] %s16_s13 }
   0x4   :  { %19 = dma.hbm_to_vmem [thread:$0]  %s15_s11, 128, %s17_s13, [#allocation3]  }
   0x5   :  { %s27_s18 = sshll.u32 %s138_s17, 4  ;;  %s28_s18 = int_to_ptr.vmem [resolvable:$true] %s27_s18 }
   0x6   :  { %30 = dma.hbm_to_vmem [thread:$0]  %s26_s16, 128, %s28_s18, [#allocation5]  }
   0x7   :  { %133 = dma.done.wait [#allocation3], 128  }
   0x8   :  { %134 = vsyncadd [#allocation3], 4294967168 }
   0x9   :  { %135 = dma.done.wait [#allocation5], 128  }
   0xa   :  { %136 = vsyncadd [#allocation5], 4294967168  ;;  %v39_v0 = vld [vmem:[#allocation2] sm:$0xff]  ;;  %v40_v1 = vld [vmem:[#allocation4] sm:$0xff]  ;;  %s139_s0 = smov 96   ;;  %s140_s19 = smov 32  }
   0xb   :  { %v41_v2 = vsub.f32 %v39_v0, %v40_v1  ;;  %s141_s20 = smov 64   ;;  %vm43_vm0 = vcmask 261120   ;;  %vm66_vm1 = vcmask 7168   ;;  %vm68_vm2 = vcmask 15360  }
   0xc   :  { %vm70_vm3 = vcmask 23552   ;;  %vm72_vm4 = vcmask 31744  }
   0xd   :  { %v42_v3 = vmul.f32 %v41_v2, %v41_v2 }
   0xf   :  { %48 = vrot.lane.b32.xlu0 %v42_v3, %s139_s0  ;;  %60 = vrot.lane.b32.xlu1 %v42_v3, %s140_s19  ;;  %v44_v4 = vsel %vm43_vm0, %v42_v3, 0.0 }
  0x17   :  { %54 = vrot.lane.b32.xlu0 %v42_v3, %s141_s20 }
  0x39   :  { %45 = vadd.xlane.f32.xlu1 %v44_v4 }
  0x81   :  { %v49_v5 = vpop.permute.xlu0 %48  ;;  %v61_v6 = vpop.permute.xlu1 %60 }
  0x82   :  { %v51_v7 = vsel %vm43_vm0, %v49_v5, 0.0  ;;  %v63_v8 = vsel %vm43_vm0, %v61_v6, 0.0 }
  0x83   :  { %52 = vadd.xlane.f32.xlu2 %v51_v7  ;;  %64 = vadd.xlane.f32.xlu0 %v63_v8 }
  0x89   :  { %v55_v9 = vpop.permute.xlu0 %54 }
  0x8a   :  { %v57_v10 = vsel %vm43_vm0, %v55_v9, 0.0 }
  0x8b   :  { %58 = vadd.xlane.f32.xlu2 %v57_v10 }
  0xac   :  { %v46_v12 = vpop.xlane.xlu1 %45 }
  0xf6   :  { %v53_v11 = vpop.xlane.xlu2 %52  ;;  %v65_v13 = vpop.xlane.xlu0 %64 }
  0xf7   :  { %v67_v14 = vsel %vm66_vm1, %v46_v12, %v53_v11 }
  0xfe   :  { %v59_v15 = vpop.xlane.xlu2 %58 }
  0xff   :  { %v69_v16 = vsel %vm68_vm2, %v67_v14, %v59_v15 }
 0x100   :  { %v71_v17 = vsel %vm70_vm3, %v69_v16, %v65_v13 }
 0x101   :  { %73 = vst.msk [vmem:[%s168_s2] sm:$0xff] %vm72_vm4, %v71_v17 }
 0x102   :  { %78 = vsyncpa [#allocation3], 1 }
 0x103   :  { %79 = vsyncpa [#allocation5], 1 }

</bundles_post_ra>
